<compile_context>
chip_gen: v6e
topology: v6e:2x2x1
jax: 0.10.0
libtpu: 0.0.40
codegen_flags: <defaults>
</compile_context>

<pallas_src>
import math
import functools

import jax
import jax.numpy as jnp
from jax import lax
from jax.experimental import pallas as pl
from jax.experimental.pallas import tpu as pltpu


def _mha_kernel(xq_ref, xf_ref, wqkv_ref, wo_ref, out_ref, k_sc, v_sc, *,
                n_heads, qkv_dim, d_model):
    """One (batch, q-tile) grid step.

    xq_ref:   (1, TQ, D)   bf16   query rows for this tile
    xf_ref:   (1, T,  D)   bf16   full sequence (source of K / V)
    wqkv_ref: (3D, D)      bf16   QKV weight (PyTorch layout), Q rows pre-scaled
    wo_ref:   (H, dh, D)   bf16   W_o^T reshaped head-major in the wrapper
    out_ref:  (1, TQ, D)   f32
    k_sc:     (H, dh, T)   bf16   per-batch K cache (VMEM scratch)
    v_sc:     (H, dh, T)   bf16   per-batch V cache (VMEM scratch)
    """
    tq = xq_ref.shape[1]
    t = xf_ref.shape[1]

    # ---- K / V projection: computed once per batch element, cached in VMEM -----
    @pl.when(pl.program_id(1) == 0)
    def _():
        xf = xf_ref[0]                                          # (T, D) bf16
        w_k = wqkv_ref[d_model:2 * d_model, :]                  # (D, D) bf16
        w_v = wqkv_ref[2 * d_model:3 * d_model, :]              # (D, D) bf16
        # (D, D) x (T, D), contract D -> (D, T); f32 accumulation on the MXU.
        k = lax.dot_general(w_k, xf, (((1,), (1,)), ((), ())),
                            preferred_element_type=jnp.float32)
        v = lax.dot_general(w_v, xf, (((1,), (1,)), ((), ())),
                            preferred_element_type=jnp.float32)
        k_sc[...] = k.reshape(n_heads, qkv_dim, t).astype(jnp.bfloat16)
        v_sc[...] = v.reshape(n_heads, qkv_dim, t).astype(jnp.bfloat16)

    # ---- Q projection for this query tile --------------------------------------
    xq = xq_ref[0]                                              # (TQ, D) bf16
    w_q = wqkv_ref[0:d_model, :]                                # (D, D) bf16 (scaled)
    q = lax.dot_general(w_q, xq, (((1,), (1,)), ((), ())),
                        preferred_element_type=jnp.float32)     # (D, TQ)
    # head-major: (H, dh, TQ) -> (H, TQ, dh); bf16 feed for the logits matmul.
    q = jnp.swapaxes(q.reshape(n_heads, qkv_dim, tq), 1, 2).astype(jnp.bfloat16)

    k = k_sc[...]                                               # (H, dh, T) bf16
    v = v_sc[...]                                               # (H, dh, T) bf16

    # ---- Head-batched attention -------------------------------------------------
    # logits[h, t, s] = (q_h[t] . k_h[s]) / sqrt(dh)   (scale pre-folded into W_q)
    logits = lax.dot_general(q, k, (((2,), (1,)), ((0,), (0,))),
                             preferred_element_type=jnp.float32)  # (H, TQ, T)

    # NOTE: the reference module's torch.masked_fill is non-in-place and its result
    # is discarded, so NO causal mask is applied here (exact semantic match).
    m = jnp.max(logits, axis=-1, keepdims=True)
    p = jnp.exp(logits - m)                                       # (H, TQ, T)
    l = jnp.sum(p, axis=-1, keepdims=True)                        # (H, TQ, 1)

    # attn[h, t, j] = sum_s p[h, t, s] * v[h, j, s]   (normalize AFTER the matmul)
    attn = lax.dot_general(p.astype(jnp.bfloat16), v,
                           (((2,), (2,)), ((0,), (0,))),
                           preferred_element_type=jnp.float32)    # (H, TQ, dh)
    attn = attn * pl.reciprocal(l, approx=True)

    # ---- Output projection (head recombination folded into the contraction) ----
    # out[t, e] = sum_{h, j} attn[h, t, j] * W_o^T[h*dh + j, e]
    out_h = lax.dot_general(attn.astype(jnp.bfloat16), wo_ref[...],
                            (((2,), (1,)), ((0,), (0,))),
                            preferred_element_type=jnp.float32)   # (H, TQ, D)
    out_ref[0] = jnp.sum(out_h, axis=0).astype(out_ref.dtype)


def multi_head_attention(x, w_qkv, w_o, n_heads):
    """x: [B, T, D] f32; w_qkv: [3D, D]; w_o: [D, D] (PyTorch Linear layouts)."""
    B, T, D = x.shape
    assert D % n_heads == 0
    qkv_dim = D // n_heads

    # ---- wrapper-side (free) layout / precision plumbing ------------------------
    # Fold the 1/sqrt(dh) attention scale into the Q rows of W_qkv.
    w_qkv_s = w_qkv.at[:D, :].multiply(1.0 / math.sqrt(qkv_dim))
    # Pre-transpose W_o and reshape head-major: wo_heads[h, j, :] == W_o^T[h*dh+j, :].
    wo_heads = jnp.transpose(w_o).reshape(n_heads, qkv_dim, D)
    # bf16 MXU operands; all accumulation stays f32 inside the kernel.
    x_bf = x.astype(jnp.bfloat16)
    wqkv_bf = w_qkv_s.astype(jnp.bfloat16)
    wo_bf = wo_heads.astype(jnp.bfloat16)

    # Query-tile size: 128 rows when the sequence allows it, else the full sequence.
    # TODO(synk): for very long T, add a KV inner loop (flash-style online softmax)
    # so the (H, TQ, T) logits tile stays bounded on v7x's 64 MiB VMEM.
    TQ = 128 if T % 128 == 0 else T
    grid = (B, T // TQ)

    kernel = functools.partial(_mha_kernel, n_heads=n_heads, qkv_dim=qkv_dim,
                               d_model=D)

    return pl.pallas_call(
        kernel,
        out_shape=jax.ShapeDtypeStruct((B, T, D), x.dtype),
        grid_spec=pltpu.PrefetchScalarGridSpec(
            num_scalar_prefetch=0,
            grid=grid,
            in_specs=[
                # query-row tile of x
                pl.BlockSpec((1, TQ, D), lambda b, qi: (b, qi, 0)),
                # full sequence of x (K/V source); block index is constant in qi,
                # so Pallas only re-DMAs it when the batch index changes.
                pl.BlockSpec((1, T, D), lambda b, qi: (b, 0, 0)),
                # resident weights (constant block index -> fetched once).
                pl.BlockSpec((3 * D, D), lambda b, qi: (0, 0)),
                pl.BlockSpec((n_heads, qkv_dim, D), lambda b, qi: (0, 0, 0)),
            ],
            out_specs=pl.BlockSpec((1, TQ, D), lambda b, qi: (b, qi, 0)),
            scratch_shapes=[
                # per-batch K / V caches, filled at qi == 0 and reused across q-tiles
                pltpu.VMEM((n_heads, qkv_dim, T), jnp.bfloat16),
                pltpu.VMEM((n_heads, qkv_dim, T), jnp.bfloat16),
            ],
        ),
        compiler_params=pltpu.CompilerParams(
            # batch axis independent -> megacore / dual-TC; q-tile axis must be
            # "arbitrary" (sequential) so the K/V scratch cache is valid.
            dimension_semantics=("parallel", "arbitrary"),
            vmem_limit_bytes=64 * 1024 * 1024,
        ),
    )(x_bf, x_bf, wqkv_bf, wo_bf)


def _reference(x, w_qkv, w_o, n_heads):
    """Pure-JAX f32 reference matching the PyTorch forward exactly."""
    B, T, D = x.shape
    dh = D // n_heads
    qkv = jnp.einsum("btd,ed->bte", x, w_qkv)              # Linear, no bias
    q, k, v = jnp.split(qkv, 3, axis=-1)

    def heads(a):
        return a.reshape(B, T, n_heads, dh).transpose(0, 2, 1, 3)  # (B,H,T,dh)

    q, k, v = heads(q), heads(k), heads(v)
    logits = jnp.einsum("bhqd,bhkd->bhqk", q, k) / math.sqrt(dh)
    # mask intentionally NOT applied (non-in-place masked_fill in the reference)
    p = jax.nn.softmax(logits, axis=-1)
    attn = jnp.einsum("bhqk,bhkd->bhqd", p, v)             # (B,H,T,dh)
    attn = attn.transpose(0, 2, 1, 3).reshape(B, T, D)
    return jnp.einsum("btd,ed->bte", attn, w_o)


if __name__ == "__main__":
    # Shapes consistent with the module: block_size=T=8, d_model=32, n_heads=4.
    B, T, D, H = 2, 8, 32, 4

    key = jax.random.PRNGKey(0)
    kx, kq, ko = jax.random.split(key, 3)
    x = jax.random.normal(kx, (B, T, D), dtype=jnp.float32)
    # PyTorch-Linear-like init: uniform(-1/sqrt(D), 1/sqrt(D))
    bound = 1.0 / math.sqrt(D)
    w_qkv = jax.random.uniform(kq, (3 * D, D), jnp.float32, -bound, bound)
    w_o = jax.random.uniform(ko, (D, D), jnp.float32, -bound, bound)

    out = jax.block_until_ready(multi_head_attention(x, w_qkv, w_o, H))
    ref = _reference(x, w_qkv, w_o, H)

    assert out.shape == (B, T, D)
    # bf16 MXU operands (f32 accumulation) vs. an all-f32 reference -> bf16-level tol.
    assert jnp.allclose(out, ref, atol=5e-2, rtol=5e-2), float(
        jnp.max(jnp.abs(out - ref)))

    print("KERNEL_OK")
</pallas_src>

<mosaic_0001>
module attributes {stable_mosaic.version = 11 : i64} {
  func.func @_mha_kernel(%arg0: i32, %arg1: i32, %arg2: memref<1x8x32xbf16, #tpu.memory_space<vmem>>, %arg3: memref<1x8x32xbf16, #tpu.memory_space<vmem>>, %arg4: memref<96x32xbf16, #tpu.memory_space<vmem>>, %arg5: memref<4x8x32xbf16, #tpu.memory_space<vmem>>, %arg6: memref<1x8x32xf32, #tpu.memory_space<vmem>>, %arg7: memref<4x8x8xbf16, #tpu.memory_space<vmem>>, %arg8: memref<4x8x8xbf16, #tpu.memory_space<vmem>>) attributes {dimension_semantics = [#tpu.dimension_semantics<parallel>, #tpu.dimension_semantics<arbitrary>], iteration_bounds = array<i64: 2, 1>, scalar_prefetch = 0 : i64, scratch_operands = 2 : i64, tpu.core_type = #tpu.core_type<tc>, window_params = [{transform_indices = @transform_0, window_bounds = array<i64: 1, 8, 32>}, {transform_indices = @transform_1, window_bounds = array<i64: 1, 8, 32>}, {pipeline_mode = #tpu.pipeline_mode<synchronous>, transform_indices = @transform_2, window_bounds = array<i64: 96, 32>}, {pipeline_mode = #tpu.pipeline_mode<synchronous>, transform_indices = @transform_3, window_bounds = array<i64: 4, 8, 32>}, {transform_indices = @transform_4, window_bounds = array<i64: 1, 8, 32>}]} {
    %c0_i32 = arith.constant 0 : i32
    %0 = arith.cmpi eq, %arg1, %c0_i32 : i32
    %1 = arith.extui %0 : i1 to i32
    %c0_i32_0 = arith.constant 0 : i32
    %2 = arith.cmpi ne, %1, %c0_i32_0 : i32
    scf.if %2 {
      %c0_23 = arith.constant 0 : index
      %c0_24 = arith.constant 0 : index
      %c0_25 = arith.constant 0 : index
      %32 = vector.load %arg3[%c0_23, %c0_24, %c0_25] : memref<1x8x32xbf16, #tpu.memory_space<vmem>>, vector<1x8x32xbf16>
      %33 = vector.shape_cast %32 : vector<1x8x32xbf16> to vector<8x32xbf16>
      %c32 = arith.constant 32 : index
      %c0_26 = arith.constant 0 : index
      %34 = vector.load %arg4[%c32, %c0_26] : memref<96x32xbf16, #tpu.memory_space<vmem>>, vector<32x32xbf16>
      %c64 = arith.constant 64 : index
      %c0_27 = arith.constant 0 : index
      %35 = vector.load %arg4[%c64, %c0_27] : memref<96x32xbf16, #tpu.memory_space<vmem>>, vector<32x32xbf16>
      %cst_28 = arith.constant dense<0.000000e+00> : vector<32x8xf32>
      %36 = tpu.matmul %34, %33, %cst_28 {dimension_numbers = #tpu.dot_dimension_numbers<[1], [1], [0], [0], [0, 0, 1, 0], [], []>} : vector<32x32xbf16>, vector<8x32xbf16>, vector<32x8xf32> -> vector<32x8xf32>
      %cst_29 = arith.constant dense<0.000000e+00> : vector<32x8xf32>
      %37 = tpu.matmul %35, %33, %cst_29 {dimension_numbers = #tpu.dot_dimension_numbers<[1], [1], [0], [0], [0, 0, 1, 0], [], []>} : vector<32x32xbf16>, vector<8x32xbf16>, vector<32x8xf32> -> vector<32x8xf32>
      %38 = vector.shape_cast %36 : vector<32x8xf32> to vector<4x8x8xf32>
      %39 = arith.truncf %38 : vector<4x8x8xf32> to vector<4x8x8xbf16>
      %c0_30 = arith.constant 0 : index
      %c0_31 = arith.constant 0 : index
      %c0_32 = arith.constant 0 : index
      %40 = vector.load %arg7[%c0_30, %c0_31, %c0_32] : memref<4x8x8xbf16, #tpu.memory_space<vmem>>, vector<4x8x8xbf16>
      tpu.vector_store %arg7[%c0_30, %c0_31, %c0_32], %39 {strides = array<i32>} : memref<4x8x8xbf16, #tpu.memory_space<vmem>>, vector<4x8x8xbf16>,
      %41 = vector.shape_cast %37 : vector<32x8xf32> to vector<4x8x8xf32>
      %42 = arith.truncf %41 : vector<4x8x8xf32> to vector<4x8x8xbf16>
      %c0_33 = arith.constant 0 : index
      %c0_34 = arith.constant 0 : index
      %c0_35 = arith.constant 0 : index
      %43 = vector.load %arg8[%c0_33, %c0_34, %c0_35] : memref<4x8x8xbf16, #tpu.memory_space<vmem>>, vector<4x8x8xbf16>
      tpu.vector_store %arg8[%c0_33, %c0_34, %c0_35], %42 {strides = array<i32>} : memref<4x8x8xbf16, #tpu.memory_space<vmem>>, vector<4x8x8xbf16>,
    } else {
    }
    %c0 = arith.constant 0 : index
    %c0_1 = arith.constant 0 : index
    %c0_2 = arith.constant 0 : index
    %3 = vector.load %arg2[%c0, %c0_1, %c0_2] : memref<1x8x32xbf16, #tpu.memory_space<vmem>>, vector<1x8x32xbf16>
    %4 = vector.shape_cast %3 : vector<1x8x32xbf16> to vector<8x32xbf16>
    %c0_3 = arith.constant 0 : index
    %c0_4 = arith.constant 0 : index
    %5 = vector.load %arg4[%c0_3, %c0_4] : memref<96x32xbf16, #tpu.memory_space<vmem>>, vector<32x32xbf16>
    %cst = arith.constant dense<0.000000e+00> : vector<32x8xf32>
    %6 = tpu.matmul %5, %4, %cst {dimension_numbers = #tpu.dot_dimension_numbers<[1], [1], [0], [0], [0, 0, 1, 0], [], []>} : vector<32x32xbf16>, vector<8x32xbf16>, vector<32x8xf32> -> vector<32x8xf32>
    %7 = vector.shape_cast %6 : vector<32x8xf32> to vector<4x8x8xf32>
    %8 = tpu.transpose %7, [0, 2, 1] : vector<4x8x8xf32> -> vector<4x8x8xf32>
    %9 = arith.truncf %8 : vector<4x8x8xf32> to vector<4x8x8xbf16>
    %c0_5 = arith.constant 0 : index
    %c0_6 = arith.constant 0 : index
    %c0_7 = arith.constant 0 : index
    %10 = vector.load %arg7[%c0_5, %c0_6, %c0_7] : memref<4x8x8xbf16, #tpu.memory_space<vmem>>, vector<4x8x8xbf16>
    %c0_8 = arith.constant 0 : index
    %c0_9 = arith.constant 0 : index
    %c0_10 = arith.constant 0 : index
    %11 = vector.load %arg8[%c0_8, %c0_9, %c0_10] : memref<4x8x8xbf16, #tpu.memory_space<vmem>>, vector<4x8x8xbf16>
    %cst_11 = arith.constant dense<0.000000e+00> : vector<4x8x8xf32>
    %12 = tpu.matmul %9, %10, %cst_11 {dimension_numbers = #tpu.dot_dimension_numbers<[2], [1], [1], [2], [0, 0, 0, 1, 1, 2], [0], [0]>} : vector<4x8x8xbf16>, vector<4x8x8xbf16>, vector<4x8x8xf32> -> vector<4x8x8xf32>
    %cst_12 = arith.constant dense<0xFF800000> : vector<4x8xf32>
    %13 = vector.multi_reduction <maximumf>, %12, %cst_12 [2] : vector<4x8x8xf32> to vector<4x8xf32>
    %14 = vector.shape_cast %13 : vector<4x8xf32> to vector<4x8x1xf32>
    %15 = vector.broadcast %14 : vector<4x8x1xf32> to vector<4x8x8xf32>
    %16 = arith.subf %12, %15 : vector<4x8x8xf32>
    %17 = math.exp %16 : vector<4x8x8xf32>
    %cst_13 = arith.constant dense<0.000000e+00> : vector<4x8xf32>
    %18 = vector.multi_reduction <add>, %17, %cst_13 [2] : vector<4x8x8xf32> to vector<4x8xf32>
    %19 = vector.shape_cast %18 : vector<4x8xf32> to vector<4x8x1xf32>
    %20 = arith.truncf %17 : vector<4x8x8xf32> to vector<4x8x8xbf16>
    %cst_14 = arith.constant dense<0.000000e+00> : vector<4x8x8xf32>
    %21 = tpu.matmul %20, %11, %cst_14 {dimension_numbers = #tpu.dot_dimension_numbers<[2], [2], [1], [1], [0, 0, 0, 1, 1, 1], [0], [0]>} : vector<4x8x8xbf16>, vector<4x8x8xbf16>, vector<4x8x8xf32> -> vector<4x8x8xf32>
    %22 = tpu.reciprocal %19 {approx = true} : vector<4x8x1xf32> -> vector<4x8x1xf32>
    %23 = vector.broadcast %22 : vector<4x8x1xf32> to vector<4x8x8xf32>
    %24 = arith.mulf %21, %23 : vector<4x8x8xf32>
    %25 = arith.truncf %24 : vector<4x8x8xf32> to vector<4x8x8xbf16>
    %c0_15 = arith.constant 0 : index
    %c0_16 = arith.constant 0 : index
    %c0_17 = arith.constant 0 : index
    %26 = vector.load %arg5[%c0_15, %c0_16, %c0_17] : memref<4x8x32xbf16, #tpu.memory_space<vmem>>, vector<4x8x32xbf16>
    %cst_18 = arith.constant dense<0.000000e+00> : vector<4x8x32xf32>
    %27 = tpu.matmul %25, %26, %cst_18 {dimension_numbers = #tpu.dot_dimension_numbers<[2], [1], [1], [2], [0, 0, 0, 1, 1, 2], [0], [0]>} : vector<4x8x8xbf16>, vector<4x8x32xbf16>, vector<4x8x32xf32> -> vector<4x8x32xf32>
    %cst_19 = arith.constant dense<0.000000e+00> : vector<8x32xf32>
    %28 = vector.multi_reduction <add>, %27, %cst_19 [0] : vector<4x8x32xf32> to vector<8x32xf32>
    %c0_20 = arith.constant 0 : index
    %c0_21 = arith.constant 0 : index
    %c0_22 = arith.constant 0 : index
    %29 = vector.load %arg6[%c0_20, %c0_21, %c0_22] : memref<1x8x32xf32, #tpu.memory_space<vmem>>, vector<1x8x32xf32>
    %30 = vector.shape_cast %29 : vector<1x8x32xf32> to vector<8x32xf32>
    %31 = vector.shape_cast %28 : vector<8x32xf32> to vector<1x8x32xf32>
    tpu.vector_store %arg6[%c0_20, %c0_21, %c0_22], %31 {strides = array<i32>} : memref<1x8x32xf32, #tpu.memory_space<vmem>>, vector<1x8x32xf32>,
    return
  }
  func.func @transform_0(%arg0: i32, %arg1: i32) -> (i32, i32, i32) {
    %c0_i32 = arith.constant 0 : i32
    %c0_i32_0 = arith.constant 0 : i32
    return %arg0, %arg1, %c0_i32 : i32, i32, i32
  }
  func.func @transform_1(%arg0: i32, %arg1: i32) -> (i32, i32, i32) {
    %c0_i32 = arith.constant 0 : i32
    %c0_i32_0 = arith.constant 0 : i32
    %c0_i32_1 = arith.constant 0 : i32
    return %arg0, %c0_i32, %c0_i32_0 : i32, i32, i32
  }
  func.func @transform_2(%arg0: i32, %arg1: i32) -> (i32, i32) {
    %c0_i32 = arith.constant 0 : i32
    %c0_i32_0 = arith.constant 0 : i32
    %c0_i32_1 = arith.constant 0 : i32
    return %c0_i32, %c0_i32_0 : i32, i32
  }
  func.func @transform_3(%arg0: i32, %arg1: i32) -> (i32, i32, i32) {
    %c0_i32 = arith.constant 0 : i32
    %c0_i32_0 = arith.constant 0 : i32
    %c0_i32_1 = arith.constant 0 : i32
    %c0_i32_2 = arith.constant 0 : i32
    return %c0_i32, %c0_i32_0, %c0_i32_1 : i32, i32, i32
  }
  func.func @transform_4(%arg0: i32, %arg1: i32) -> (i32, i32, i32) {
    %c0_i32 = arith.constant 0 : i32
    %c0_i32_0 = arith.constant 0 : i32
    return %arg0, %arg1, %c0_i32 : i32, i32, i32
  }
}

</mosaic_0001>

<bundles_post_ra>
// kernel: tpu_custom_call.1
= control target key start
LH: loop header
LB: loop body
LE: loop exit
PB: predicated region body
PF: predicated region fallthrough
CT: control target
= control target key end

     0   :  { %9 = vsyncpa [#allocation5], 0  ;;  %s1927_s0 = inlined_call_operand.vmem [shape: bf16[2,8,32], index: 0, kind: input, shape index: {}]   ;;  %s1928_s1 = inlined_call_operand.vmem [shape: bf16[2,8,32], index: 1, kind: input, shape index: {}]   ;;  %s1929_s2 = inlined_call_operand.vmem [shape: bf16[96,32], index: 2, kind: input, shape index: {}]   ;;  %s1930_s3 = inlined_call_operand.vmem [shape: bf16[4,8,32], index: 3, kind: input, shape index: {}]   ;;  %s1931_s4 = inlined_call_operand.hbm [shape: f32[2,8,32], index: 4, kind: output, shape index: {}]  }
   0x1   :  { %11 = vsyncpa [#allocation5 + $0x1], 0  ;;  %s1691_s15 = smov 0   ;;  %s1693_s16 = smov 0  }
   0x2   :  { %s1695_s17 = smov 0   ;;  %s1697_s18 = smov 0  }
   0x3   :  { %s1699_s19 = smov 0   ;;  %s1701_s20 = smov 0  }
   0x4 LB: > { %s1330_s21 = sadd.s32 4294967295, %s1661_s20   ;;  %s1331_s22 = sadd.s32 4294967294, %s1661_s20   ;;  %s1661_s20 = sphi %s1701_s20, %s17_s20   ;;  %s1657_s19 = sphi %s1699_s19, %s1938_s19   ;;  %s1653_s18 = sphi %s1697_s18, %s1937_s18   ;;  %s1649_s17 = sphi %s1695_s17, %s1936_s17   ;;  %s1645_s16 = sphi %s1693_s16, %s1935_s16   ;;  %s1641_s15 = sphi %s1691_s15, %s1934_s15  }
   0x5   : > { %s29_s23 = sadd.s32 1, %s1657_s19  ;;  %s134_s24 = sadd.s32 1, %s1649_s17 }
   0x6   : > { %p31_p0 = scmp.ge.s32.totalorder %s29_s23, 2  ;;  %p144_p1 = scmp.ne.s32.totalorder %s1649_s17, %s1645_s16 }
   0x7   : > { %p145_p2 = scmp.eq.s32.totalorder %s1330_s21, 1  ;;  %p150_p3 = scmp.ne.s32.totalorder %s1645_s16, %s1641_s15 }
   0x8   : > { %s1940_s23 = smov (%p31_p0, %s29_s23), 0  ;;  %p151_p5 = scmp.eq.s32.totalorder %s1331_s22, 1 }
   0x9   : > { %p1731_p4 = por %p145_p2, %p144_p1  ;;  %s129_s26 = ssub.s32 %s1657_s19, %s1940_s23 }
   0xa   : > { %p1334_p6 = scmp.ge.s32.totalorder %s1661_s20, 1  ;;  %p132_p7 = scmp.eq.s32.totalorder %s129_s26, 0 }
   0xb   : > { %p1738_p8 = por %p151_p5, %p150_p3  ;;  %p192_p9 = scmp.lt.s32.totalorder %s1661_s20, 3 }
   0xc   : > { %s1744_s28 = scalar_select %p132_p7, %s1649_s17, %s134_s24  }
   0xd   : > { %p193_p10 = pnand %p1334_p6, %p192_p9 }
   0xe   : > { %p224_p11 = scmp.lt.s32.totalorder (!%p193_p10), %s1653_s18, 1  ;;  %s221_s21 = sand.u32 (!%p193_p10), 1, %s1645_s16  }
   0xf   : > { %196 = sbr.rel (%p193_p10) target bundleno = 1141 (0x475), region = 36  ;;  %s1335_s22 = sshll.u32 (!%p193_p10), %s221_s21, 3 }
  0x10   : > { %s1363_s24 = sshll.u32 (!%p193_p10), %s1653_s18, 7  ;;  %s223_s26 = scalar_lea.vmem (!%p193_p10), [#allocation4], %s1335_s22 }
  0x11   : > { %s1247_s29 = sshll.u32 (!%p193_p10), %s223_s26, 4  ;;  %s1665_s8 = smov (!%p193_p10), [#allocation4]   ;;  %s1882_s29 = int_to_ptr.vmem [resolvable:$true] %s1247_s29 }
  0x12   : > { %s1585_s7 = scalar_lea.vmem (!%p193_p10), %s1882_s29, 128 }
  0x13   : > { %p1586_p12 = scmp.ne.s32.totalorder (!%p193_p10), %s1882_s29, %s1585_s7 }
  0x14   : > { %v1563_v0 = vld [vmem:[%s1929_s2 + $0x10] sm:$0xff]   ;;  %s225_s5 = scalar_select %p224_p11, %s1653_s18, 1  ;;  %vm259_vm0 = vcmask 261120   ;;  %v1564_v4 = vld [vmem:[%s1929_s2 + $0x18] sm:$0xff]   ;;  %v1565_v5 = vld [vmem:[%s1929_s2] sm:$0xff]   ;;  %v1663_v10 = vmov 0.0  }
  0x15   : > { %1401 = vmatprep.mubr.msk.bf16.mxu0 %vm259_vm0, %v1563_v0  ;;  %v1566_v7 = vld [vmem:[%s1929_s2 + $0x8] sm:$0xff]   ;;  %v1567_v8 = vld [vmem:[%s1929_s2 + $0x20] sm:$0xff]   ;;  %vm387_vm1 = vcmask 60416   ;;  %vm618_vm2 = vcmask 1043456   ;;  %vm1664_vm3 = vmmov 0   ;;  %vm614_vm4 = vcmask 64512   ;;  %p1587_p13 = pnand %p1586_p12, %p1731_p4 }
  0x16   : > { %s1336_s6 = sshll.u32 %s225_s5, 2  ;;  %v1568_v9 = vld [vmem:[%s1929_s2 + $0x28] sm:$0xff]   ;;  %1407 = vmatprep.mubr.msk.bf16.mxu1 %vm259_vm0, %v1567_v8  ;;  %s1233_s18 = scalar_lea.sflag [#allocation5], %s221_s21 }
  0x17   : > { %s234_s9 = scalar_lea.vmem %s1928_s1, %s1336_s6  ;;  %s230_s12 = scalar_lea.vmem %s1927_s0, %s1336_s6 }
  0x18   : > { %v240_v1 = vld [vmem:[%s234_s9] sm:$0xf]  ;;  %s1880_s6 = scalar_lea.hbm %s1931_s4, %s1363_s24  ;;  %p1588_p0 = pneg %p1587_p13 }
  0x19   : > { %v400_v2 = vld [vmem:[%s230_s12] sm:$0xf]  ;;  %1489 = vmatprep.subr.msk.bf16.mxu0 %vm259_vm0, %v240_v1  ;;  %v267_v3 = vsel %vm259_vm0, %v240_v1, 0  ;;  %1490 = vmatprep.subr.msk.bf16.mxu1 %vm259_vm0, %v240_v1  ;;  %s1589_s9 = sshll.u32 %s1665_s8, 4  ;;  %s1590_s9 = int_to_ptr.vmem [resolvable:$false] %s1589_s9 }
  0x1a   : > { %1400 = vmatpush3.bf16.xpose.msra.mxu0 %v267_v3  ;;  %1406 = vmatpush3.bf16.xpose.msra.mxu1 %v267_v3  ;;  %v423_v6 = vsel %vm259_vm0, %v400_v2, 0  ;;  %s1591_s10 = scalar_lea.vmem %s1590_s9, 256  ;;  %p1592_p1 = scmp.lt.s32.totalorder %s1882_s29, %s1590_s9 }
  0x1b   : > { %1491 = vmatprep.subr.msk.bf16.mxu0 %vm259_vm0, %v400_v2  ;;  %1417 = vmatprep.subr.bf16.mxu1 %v1663_v10  ;;  %p1593_p2 = scmp.lt.s32.totalorder %s1591_s10, %s1585_s7 }
  0x1d   : > { %p1594_p3 = por %p1593_p2, %p1592_p1 }
  0x1f   : > { %p1595_p5 = pnand %p1594_p3, %p1588_p0 }
  0x21   : > { %1402 = vmatmul.mubr.msk.bf16.vlgmr.msra.gmra.mxu0 %vm259_vm0, %v1564_v4  ;;  %1408 = vmatmul.mubr.msk.bf16.vlgmr.msra.gmra.mxu1 %vm259_vm0, %v1568_v9 }
  0x22   : > { %1412 = vmatpush3.bf16.xpose.msra.mxu0 %v423_v6  ;;  %1413 = vmatprep.mubr.msk.bf16.mxu0 %vm259_vm0, %v1565_v5 }
  0x23   : > { %1423 = vmatprep.subr.bf16.mxu0 %v1663_v10  ;;  %1419 = vmatprep.mubr.msk.bf16.mxu1 %vm1664_vm3, %v1663_v10 }
  0x29   : > { %1414 = vmatmul.mubr.msk.bf16.vlgmr.msra.gmra.mxu0 %vm259_vm0, %v1566_v7 }
  0x2a   : > { %1425 = vmatprep.mubr.msk.bf16.mxu0 %vm1664_vm3, %v1663_v10 }
  0xe1   : > { %v1403_v11 = vpop.f32.mrf.mxu0  ;;  %v1409_v29 = vpop.f32.mrf.mxu1 }
  0xe2   : > { %v385_v12 = vpack.c.bf16 %v1403_v11, %v1403_v11  ;;  %v394_v30 = vpack.c.bf16 %v1409_v29, %v1409_v29 }
  0xe3   : > { %v303_v13 = vpop.f32.mrf.mxu0  ;;  %v368_v31 = vpop.f32.mrf.mxu1 }
  0xe4   : > { %390 = vst.msk [vmem:[#allocation2 + $0x8] sm:$0xf] %vm387_vm1, %v385_v12  ;;  %v383_v14 = vpack.c.bf16 %v303_v13, %v303_v13  ;;  %398 = vst.msk [vmem:[#allocation3 + $0x8] sm:$0xf] %vm387_vm1, %v394_v30  ;;  %v392_v32 = vpack.c.bf16 %v368_v31, %v368_v31 }
  0xe5   : > { %v1404_v15 = vpop.f32.mrf.mxu0  ;;  %v1410_v33 = vpop.f32.mrf.mxu1 }
  0xe6   : > { %388 = vst.msk [vmem:[#allocation2] sm:$0xf] %vm387_vm1, %v383_v14  ;;  %v386_v16 = vpack.c.bf16 %v1404_v15, %v1404_v15  ;;  %396 = vst.msk [vmem:[#allocation3] sm:$0xf] %vm387_vm1, %v392_v32  ;;  %v395_v34 = vpack.c.bf16 %v1410_v33, %v1410_v33 }
  0xe7   : > { %v306_v17 = vpop.f32.mrf.mxu0  ;;  %v371_v35 = vpop.f32.mrf.mxu1 }
  0xe8   : > { %391 = vst.msk [vmem:[#allocation2 + $0xc] sm:$0xf] %vm387_vm1, %v386_v16  ;;  %v384_v18 = vpack.c.bf16 %v306_v17, %v306_v17  ;;  %399 = vst.msk [vmem:[#allocation3 + $0xc] sm:$0xf] %vm387_vm1, %v395_v34  ;;  %v393_v36 = vpack.c.bf16 %v371_v35, %v371_v35 }
  0xe9   : > { %v1415_v19 = vpop.f32.mrf.mxu0 }
  0xea   : > { %389 = vst.msk [vmem:[#allocation2 + $0x4] sm:$0xf] %vm387_vm1, %v384_v18  ;;  %397 = vst.msk [vmem:[#allocation3 + $0x4] sm:$0xf] %vm387_vm1, %v393_v36 }
  0xeb   : > { %v459_v20 = vpop.f32.mrf.mxu0  ;;  %v608_v40 = vld [vmem:[#allocation2 + $0x8] sm:$0xf] }
  0xec   : > { %v712_v44 = vsel %vm618_vm2, %v608_v40, 0  ;;  %v1036_v40 = vld [vmem:[%s1930_s3] sm:$0xf] }
  0xed   : > { %v1416_v21 = vpop.f32.mrf.mxu0  ;;  %v606_v22 = vld [vmem:[#allocation2] sm:$0xf]  ;;  %v610_v51 = vld [vmem:[#allocation3] sm:$0xf] }
  0xee   : > { %v620_v23 = vsel %vm618_vm2, %v606_v22, 0  ;;  %v1556_v28 = vpack.i.bf16 %v1416_v21, %v1415_v19  ;;  %v844_v53 = vsel %vm614_vm4, %v610_v51, 0 }
  0xef   : > { %v462_v24 = vpop.f32.mrf.mxu0  ;;  %1418 = vmatpush3.bf16.msra.mxu1 %v620_v23  ;;  %v609_v41 = vld [vmem:[#allocation2 + $0xc] sm:$0xf]  ;;  %v613_v30 = vld [vmem:[#allocation3 + $0xc] sm:$0xf] }
  0xf0   : > { %v1549_v25 = vpack.i.bf16 %v462_v24, %v459_v20  ;;  %1429 = vmatprep.subr.bf16.mxu1 %v1663_v10  ;;  %v758_v45 = vsel %vm618_vm2, %v609_v41, 0  ;;  %v982_v33 = vsel %vm614_vm4, %v613_v30, 0  ;;  %v1044_v41 = vsel %vm618_vm2, %v1036_v40, 0 }
  0xf1   : > { %v607_v26 = vld [vmem:[#allocation2 + $0x4] sm:$0xf]  ;;  %v611_v52 = vld [vmem:[#allocation3 + $0x4] sm:$0xf] }
  0xf2   : > { %1550 = vxpose.xlu0.b32.start.end [1/1] (short) (narrow) %v1549_v25, 8  ;;  %v666_v27 = vsel %vm618_vm2, %v607_v26, 0  ;;  %v890_v54 = vsel %vm614_vm4, %v611_v52, 0  ;;  %v612_v25 = vld [vmem:[#allocation3 + $0x8] sm:$0xf] }
  0xf3   : > { %1424 = vmatpush3.bf16.msra.mxu0 %v666_v27 }
  0xf4   : > { %1435 = vmatprep.subr.bf16.mxu0 %v1663_v10 }
  0xf6   : > { %1557 = vxpose.xlu0.b32.start.end [1/1] (short) (narrow) %v1556_v28, 8  ;;  %v936_v28 = vsel %vm614_vm4, %v612_v25, 0 }
 0x16e   : > { %v1551_v37 = vpop.trf.xlu0 }
 0x16f   : > { %v1555_v38 = vunpack.i.h.bf16 %v1551_v37  ;;  %v1552_v39 = vunpack.i.l.bf16 %v1551_v37 }
 0x171   : > { %v603_v42 = vpack.c.bf16 %v1555_v38, %v1555_v38  ;;  %v602_v43 = vpack.c.bf16 %v1552_v39, %v1552_v39 }
 0x172   : > { %v1558_v46 = vpop.trf.xlu0 }
 0x173   : > { %1420 = vmatmul.mubr.msk.bf16.vlgmr.msra.gmra.mxu1 %vm614_vm4, %v602_v43  ;;  %1426 = vmatmul.mubr.msk.bf16.vlgmr.msra.gmra.mxu0 %vm614_vm4, %v603_v42  ;;  %v1562_v47 = vunpack.i.h.bf16 %v1558_v46  ;;  %v1559_v48 = vunpack.i.l.bf16 %v1558_v46  ;;  %v1037_v42 = vld [vmem:[%s1930_s3 + $0x4] sm:$0xf] }
 0x174   : > { %1430 = vmatpush3.bf16.msra.mxu1 %v712_v44  ;;  %1436 = vmatpush3.bf16.msra.mxu0 %v758_v45  ;;  %v1090_v43 = vsel %vm618_vm2, %v1037_v42, 0 }
 0x175   : > { %1431 = vmatprep.mubr.msk.bf16.mxu1 %vm1664_vm3, %v1663_v10  ;;  %1437 = vmatprep.mubr.msk.bf16.mxu0 %vm1664_vm3, %v1663_v10  ;;  %v605_v49 = vpack.c.bf16 %v1562_v47, %v1562_v47  ;;  %v604_v50 = vpack.c.bf16 %v1559_v48, %v1559_v48 }
 0x176   : > { %1441 = vmatprep.subr.bf16.mxu1 %v1663_v10  ;;  %1447 = vmatprep.subr.bf16.mxu0 %v1663_v10 }
 0x17b   : > { %1432 = vmatmul.mubr.msk.bf16.vlgmr.msra.gmra.mxu1 %vm614_vm4, %v604_v50  ;;  %1438 = vmatmul.mubr.msk.bf16.vlgmr.msra.gmra.mxu0 %vm614_vm4, %v605_v49  ;;  %v1038_v50 = vld [vmem:[%s1930_s3 + $0x8] sm:$0xf] }
 0x17c   : > { %1443 = vmatprep.mubr.msk.bf16.mxu1 %vm1664_vm3, %v1663_v10  ;;  %1449 = vmatprep.mubr.msk.bf16.mxu0 %vm1664_vm3, %v1663_v10 }
 0x17d   : > { %1442 = vmatpush3.bf16.xpose.msra.mxu1 %v844_v53  ;;  %1448 = vmatpush3.bf16.xpose.msra.mxu0 %v890_v54  ;;  %v1136_v54 = vsel %vm618_vm2, %v1038_v50, 0 }
 0x17e   : > { %1453 = vmatprep.subr.bf16.mxu1 %v1663_v10  ;;  %1459 = vmatprep.subr.bf16.mxu0 %v1663_v10 }
 0x233   : > { %v656_v55 = vpop.f32.mrf.mxu1  ;;  %v702_v56 = vpop.f32.mrf.mxu0 }
 0x234   : > { %v800_v57 = vsel %vm614_vm4, %v656_v55, -inf  ;;  %v803_v62 = vsel %vm614_vm4, %v702_v56, -inf }
 0x235   : > { %v1427_v58 = vpop.f32.mrf.mxu0  ;;  %801 = vmax.xlane.f32.xlu1 %v800_v57  ;;  %v1421_v59 = vpop.f32.mrf.mxu1 }
 0x236   : > { %v1039_v58 = vld [vmem:[%s1930_s3 + $0xc] sm:$0xf] }
 0x237   : > { %v659_v60 = vpop.f32.mrf.mxu1  ;;  %v705_v61 = vpop.f32.mrf.mxu0 }
 0x239   : > { %v1428_v63 = vpop.f32.mrf.mxu0  ;;  %804 = vmax.xlane.f32.xlu1 %v803_v62  ;;  %v1422_v0 = vpop.f32.mrf.mxu1 }
 0x23a   : > { %v1182_v63 = vsel %vm618_vm2, %v1039_v58, 0 }
 0x23b   : > { %v748_v1 = vpop.f32.mrf.mxu1  ;;  %v794_v2 = vpop.f32.mrf.mxu0 }
 0x23c   : > { %v809_v3 = vsel %vm614_vm4, %v794_v2, -inf  ;;  %v806_v4 = vsel %vm614_vm4, %v748_v1, -inf }
 0x23d   : > { %v1439_v5 = vpop.f32.mrf.mxu0  ;;  %810 = vmax.xlane.f32.xlu1 %v809_v3  ;;  %807 = vmax.xlane.f32.xlu0 %v806_v4  ;;  %v1433_v6 = vpop.f32.mrf.mxu1 }
 0x23f   : > { %v751_v7 = vpop.f32.mrf.mxu1  ;;  %v797_v8 = vpop.f32.mrf.mxu0 }
 0x241   : > { %v1434_v9 = vpop.f32.mrf.mxu1  ;;  %v1440_v11 = vpop.f32.mrf.mxu0 }
 0x2be   : > { %v802_v12 = vpop.xlane.xlu1 %801 }
 0x2bf   : > { %v812_v13 = vsub.f32 %v656_v55, %v802_v12 }
 0x2c1   : > { %v816_v14 = vmul.f32 1.442695, %v812_v13 }
 0x2c2   : > { %v805_v15 = vpop.xlane.xlu1 %804 }
 0x2c3   : > { %1569 = vpow2.f32 %v816_v14  ;;  %v813_v16 = vsub.f32 %v702_v56, %v805_v15 }
 0x2c5   : > { %v818_v17 = vmul.f32 1.442695, %v813_v16 }
 0x2c6   : > { %v811_v18 = vpop.xlane.xlu1 %810  ;;  %v808_v19 = vpop.xlane.xlu0 %807 }
 0x2c7   : > { %1571 = vpow2.f32 %v818_v17  ;;  %v815_v20 = vsub.f32 %v794_v2, %v811_v18  ;;  %v814_v21 = vsub.f32 %v748_v1, %v808_v19 }
 0x2c9   : > { %v822_v22 = vmul.f32 1.442695, %v815_v20  ;;  %v820_v23 = vmul.f32 1.442695, %v814_v21 }
 0x2cb   : > { %1573 = vpow2.f32 %v820_v23 }
 0x2cc   : > { %1575 = vpow2.f32 %v822_v22 }
 0x2d0   : > { %v1570_v24 = vpop.eup %1569 }
 0x2d1   : > { %v824_v26 = vsel %vm614_vm4, %v1570_v24, 0.0  ;;  %v836_v27 = vpack.c.bf16 %v1570_v24, %v1570_v24 }
 0x2d2   : > { %825 = vadd.xlane.f32.xlu1 %v824_v26 }
 0x2d3   : > { %1444 = vmatmul.mubr.msk.bf16.vlgmr.msra.gmra.mxu1 %vm614_vm4, %v836_v27 }
 0x2d4   : > { %v1572_v29 = vpop.eup %1571  ;;  %1454 = vmatpush3.bf16.xpose.msra.mxu1 %v936_v28  ;;  %1455 = vmatprep.mubr.msk.bf16.mxu1 %vm1664_vm3, %v1663_v10 }
 0x2d5   : > { %v827_v31 = vsel %vm614_vm4, %v1572_v29, 0.0  ;;  %v837_v32 = vpack.c.bf16 %v1572_v29, %v1572_v29  ;;  %1465 = vmatprep.subr.bf16.mxu1 %v1663_v10 }
 0x2d6   : > { %828 = vadd.xlane.f32.xlu1 %v827_v31 }
 0x2d7   : > { %1450 = vmatmul.mubr.msk.bf16.vlgmr.msra.gmra.mxu0 %vm614_vm4, %v837_v32 }
 0x2d8   : > { %1460 = vmatpush3.bf16.xpose.msra.mxu0 %v982_v33  ;;  %1461 = vmatprep.mubr.msk.bf16.mxu0 %vm1664_vm3, %v1663_v10  ;;  %v1574_v34 = vpop.eup %1573 }
 0x2d9   : > { %1471 = vmatprep.subr.bf16.mxu0 %v1663_v10  ;;  %v1576_v35 = vpop.eup %1575  ;;  %v830_v36 = vsel %vm614_vm4, %v1574_v34, 0.0  ;;  %v838_v37 = vpack.c.bf16 %v1574_v34, %v1574_v34 }
 0x2da   : > { %831 = vadd.xlane.f32.xlu1 %v830_v36  ;;  %v839_v38 = vpack.c.bf16 %v1576_v35, %v1576_v35  ;;  %v833_v39 = vsel %vm614_vm4, %v1576_v35, 0.0 }
 0x2db   : > { %1456 = vmatmul.mubr.msk.bf16.vlgmr.msra.gmra.mxu1 %vm614_vm4, %v838_v37 }
 0x2dc   : > { %1467 = vmatprep.mubr.msk.bf16.mxu1 %vm1664_vm3, %v1663_v10  ;;  %1466 = vmatpush3.bf16.msra.mxu1 %v1044_v41 }
 0x2dd   : > { %1477 = vmatprep.subr.bf16.mxu1 %v1663_v10 }
 0x2de   : > { %834 = vadd.xlane.f32.xlu1 %v833_v39 }
 0x2df   : > { %1462 = vmatmul.mubr.msk.bf16.vlgmr.msra.gmra.mxu0 %vm614_vm4, %v839_v38 }
 0x2e0   : > { %1473 = vmatprep.mubr.msk.bf16.mxu0 %vm1664_vm3, %v1663_v10  ;;  %1472 = vmatpush3.bf16.msra.mxu0 %v1090_v43 }
 0x2e1   : > { %1483 = vmatprep.subr.bf16.mxu0 %v1663_v10 }
 0x35b   : > { %v826_v44 = vpop.xlane.xlu1 %825 }
 0x35c   : > { %1577 = vrcp.f32 %v826_v44 }
 0x35f   : > { %v829_v45 = vpop.xlane.xlu1 %828 }
 0x360   : > { %1579 = vrcp.f32 %v829_v45 }
 0x363   : > { %v832_v46 = vpop.xlane.xlu1 %831 }
 0x364   : > { %1581 = vrcp.f32 %v832_v46 }
 0x367   : > { %v835_v47 = vpop.xlane.xlu1 %834 }
 0x368   : > { %1583 = vrcp.f32 %v835_v47 }
 0x369   : > { %v1578_v48 = vpop.eup %1577 }
 0x36d   : > { %v1580_v55 = vpop.eup %1579 }
 0x371   : > { %v1582_v1 = vpop.eup %1581 }
 0x375   : > { %v1584_v6 = vpop.eup %1583 }
 0x393   : > { %v880_v49 = vpop.f32.mrf.mxu1 }
 0x394   : > { %v1028_v51 = vmul.f32 %v1578_v48, %v880_v49 }
 0x395   : > { %v1445_v52 = vpop.f32.mrf.mxu1 }
 0x396   : > { %v1032_v53 = vpack.c.bf16 %v1028_v51, %v1028_v51 }
 0x397   : > { %v883_v56 = vpop.f32.mrf.mxu1  ;;  %v926_v57 = vpop.f32.mrf.mxu0 }
 0x398   : > { %v1029_v59 = vmul.f32 %v1580_v55, %v926_v57  ;;  %1468 = vmatmul.mubr.msk.bf16.vlgmr.msra.gmra.mxu1 %vm614_vm4, %v1032_v53 }
 0x399   : > { %v1446_v60 = vpop.f32.mrf.mxu1  ;;  %v1451_v61 = vpop.f32.mrf.mxu0  ;;  %1478 = vmatpush3.bf16.msra.mxu1 %v1136_v54  ;;  %1479 = vmatprep.mubr.msk.bf16.mxu1 %vm1664_vm3, %v1663_v10 }
 0x39a   : > { %v1033_v62 = vpack.c.bf16 %v1029_v59, %v1029_v59 }
 0x39b   : > { %v929_v0 = vpop.f32.mrf.mxu0  ;;  %v972_v2 = vpop.f32.mrf.mxu1 }
 0x39c   : > { %1474 = vmatmul.mubr.msk.bf16.vlgmr.msra.gmra.mxu0 %vm614_vm4, %v1033_v62  ;;  %v1030_v3 = vmul.f32 %v1582_v1, %v972_v2 }
 0x39d   : > { %v1452_v4 = vpop.f32.mrf.mxu0  ;;  %1484 = vmatpush3.bf16.msra.mxu0 %v1182_v63  ;;  %1485 = vmatprep.mubr.msk.bf16.mxu0 %vm1664_vm3, %v1663_v10  ;;  %v1457_v5 = vpop.f32.mrf.mxu1 }
 0x39e   : > { %v1034_v7 = vpack.c.bf16 %v1030_v3, %v1030_v3 }
 0x39f   : > { %v1018_v8 = vpop.f32.mrf.mxu0  ;;  %v975_v9 = vpop.f32.mrf.mxu1 }
 0x3a0   : > { %v1031_v11 = vmul.f32 %v1584_v6, %v1018_v8  ;;  %1480 = vmatmul.mubr.msk.bf16.vlgmr.msra.gmra.mxu1 %vm614_vm4, %v1034_v7 }
 0x3a1   : > { %v1463_v12 = vpop.f32.mrf.mxu0  ;;  %v1458_v14 = vpop.f32.mrf.mxu1 }
 0x3a2   : > { %v1035_v13 = vpack.c.bf16 %v1031_v11, %v1031_v11 }
 0x3a3   : > { %v1021_v15 = vpop.f32.mrf.mxu0 }
 0x3a4   : > { %1486 = vmatmul.mubr.msk.bf16.vlgmr.msra.gmra.mxu0 %vm614_vm4, %v1035_v13 }
 0x3a5   : > { %v1464_v16 = vpop.f32.mrf.mxu0 }
 0x458   : > { %v1080_v17 = vpop.f32.mrf.mxu1 }
 0x459   : > { %v1224_v24 = vsel %vm259_vm0, %v1080_v17, 0.0 }
 0x45a   : > { %v1469_v18 = vpop.f32.mrf.mxu1 }
 0x45c   : > { %v1083_v10 = vpop.f32.mrf.mxu1  ;;  %v1126_v19 = vpop.f32.mrf.mxu0 }
 0x45d   : > { %v1225_v22 = vsel %vm259_vm0, %v1126_v19, 0.0 }
 0x45e   : > { %v1470_v20 = vpop.f32.mrf.mxu1  ;;  %v1475_v21 = vpop.f32.mrf.mxu0  ;;  %v1226_v26 = vadd.f32 %v1225_v22, %v1224_v24 }
 0x460   : > { %v1129_v23 = vpop.f32.mrf.mxu0  ;;  %v1172_v25 = vpop.f32.mrf.mxu1 }
 0x461   : > { %v1227_v27 = vsel %vm259_vm0, %v1172_v25, 0.0 }
 0x462   : > { %v1476_v28 = vpop.f32.mrf.mxu0  ;;  %v1481_v29 = vpop.f32.mrf.mxu1  ;;  %v1228_v30 = vadd.f32 %v1227_v27, %v1226_v26 }
 0x464   : > { %v1218_v31 = vpop.f32.mrf.mxu0  ;;  %v1175_v32 = vpop.f32.mrf.mxu1 }
 0x465   : > { %v1229_v33 = vsel %vm259_vm0, %v1218_v31, 0.0 }
 0x466   : > { %v1230_v34 = vadd.f32 %v1229_v33, %v1228_v30  ;;  %v1487_v35 = vpop.f32.mrf.mxu0  ;;  %v1482_v36 = vpop.f32.mrf.mxu1 }
 0x468   : > { %v1221_v37 = vpop.f32.mrf.mxu0  ;;  %1231 = vst.msk [vmem:[%s223_s26] sm:$0xff] %vm259_vm0, %v1230_v34 }
 0x469   : > { %1598 = shalt.err (!%p1595_p5)
}
 0x46a   : > { %s1599_s11 = scalar_lea.hbm %s1880_s6, 128  ;;  %s1603_s14 = scalar_lea.hbm %s1931_s4, 256 }
 0x46b   : > { %p1600_p6 = scmp.ne.s32.totalorder %s1880_s6, %s1599_s11  ;;  %p1604_p10 = scmp.lt.s32.totalorder %s1880_s6, %s1931_s4 }
 0x46c   : > { %p1605_p11 = scmp.lt.s32.totalorder %s1603_s14, %s1599_s11 }
 0x46d   : > { %p1601_p7 = pnand %p1600_p6, %p1731_p4 }
 0x46e   : > { %p1606_p12 = por %p1605_p11, %p1604_p10 }
 0x46f   : > { %p1602_p9 = pneg %p1601_p7 }
 0x471   : > { %p1607_p13 = pnand %p1606_p12, %p1602_p9 }
 0x473   : > { %1610 = shalt.err (!%p1607_p13)
}
 0x474   : > { %1492 = dma.vmem_to_hbm [thread:$0]  (%p1731_p4), %s1882_s29, 128, %s1880_s6, %s1233_s18   ;;  %v1488_v38 = vpop.f32.mrf.mxu0 }
 0x475 PF: > { %p1498_p0 = scmp.ge.s32.totalorder %s1661_s20, 2  ;;  %s1259_s24 = sand.u32 1, %s1641_s15  }
 0x476   : > { %s1260_s26 = scalar_lea.sflag [#allocation5], %s1259_s24 }
 0x477   : > { %p1495_p1 = pnand %p1498_p0, %p1738_p8 }
 0x479   : > { %p1496_p2 = pneg %p1495_p1 }
 0x47b   : > { %1636 = dma.done.wait (%p1496_p2), %s1260_s26, 128  }
 0x47c   : > { %1638 = vsyncadd (%p1496_p2), %s1260_s26, 4294967168  ;;  %s17_s20 = sadd.s32 1, %s1661_s20   ;;  %s1934_s15 = smov %s1645_s16 }
 0x47d   : > { %p14_p3 = scmp.ge.s32.totalorder %s17_s20, 4   ;;  %s1935_s16 = smov %s1649_s17 }
 0x47e   : > { %s1936_s17 = smov %s1744_s28  ;;  %s1937_s18 = smov %s1657_s19 }
 0x47f   : > { %s1938_s19 = smov %s1940_s23  ;;  %16 = sbr.rel (!%p14_p3) target bundleno = 4 (0x4), region = 78 }
 0x484   :  { %1265 = vsyncpa [#allocation5], 1 }
 0x485   :  { %1267 = vsyncpa [#allocation5 + $0x1], 1 }

</bundles_post_ra>
